<compile_context>
chip_gen: v7x
topology: tpu7x:2x2x1
jax: 0.10.0
libtpu: 0.0.40
codegen_flags: <defaults>
</compile_context>

<pallas_src>
import jax
import jax.numpy as jnp
from jax.experimental import pallas as pl
from jax.experimental.pallas import tpu as pltpu


def _round_up(x, m):
    return ((x + m - 1) // m) * m


def _vmem_capacity_bytes():
    try:
        return int(pltpu.get_tpu_info().vmem_capacity_bytes)
    except Exception:
        return 64 << 20  # conservative fallback: v7x per-TensorCore VMEM


def _choose_th(H, W, N, cin_p, cout_p, x_bytes, low_bytes, budget_bytes):
    """Rows of `high` per tile.  Must divide H so no padding copy is ever needed."""

    def tile_bytes(th):
        x_t = th * W * cin_p * x_bytes
        low_t = th * 4 * W * cout_p * low_bytes
        return 2 * x_t + 4 * low_t  # double-buffered x + low + out tiles

    divisors = [d for d in range(1, H + 1) if H % d == 0]
    feasible = [d for d in divisors if tile_bytes(d) <= budget_bytes] or [1]
    best_key, best = None, 1
    for d in feasible:
        grid = N * (H // d)
        aligned = (d % 8 == 0) and ((d * W) % 8 == 0)  # dense sublane tiles
        even_grid = (grid % 2 == 0) or grid == 1       # keep both v7x TCs busy
        key = (aligned, even_grid, d)
        if best_key is None or key > best_key:
            best_key, best = key, d
    return best


def _make_kernel(th, W, cout_p):
    two_c = 2 * cout_p

    def kernel(x_ref, w_ref, b_ref, low_ref, out_ref):
        # x_ref  : (th*W, cin_p)       rows ordered (w, h') inside the tile
        # w_ref  : (cin_p, 4*cout_p)   columns ordered (di, dj, c)
        # b_ref  : (1, 4*cout_p)       f32 bias replicated per tap
        # low_ref/out_ref: (th, 4*W*cout_p)  NHWC rows, columns (di, 2w+dj, c)
        y = jnp.dot(x_ref[...], w_ref[...], preferred_element_type=jnp.float32)
        y = y + b_ref[...]
        low = low_ref[...].astype(jnp.float32)
        # 2x2 de-interleave done in-VMEM: scatter the (di, w) pieces of the
        # matmul result into the NHWC output row via static lane slices.
        # TODO(synk): for very large W, replace the 2*W-way static unroll with a
        # single relayout (reshape/transpose) or a second grid axis over W.
        for di in range(2):
            for w in range(W):
                col = (di * W + w) * two_c
                piece = y[w * th:(w + 1) * th, di * two_c:(di + 1) * two_c]
                out_ref[:, col:col + two_c] = (
                    piece + low[:, col:col + two_c]).astype(out_ref.dtype)

    return kernel


def se_fpn_forward(high, low, weight, bias, *, compute_dtype=None):
    """out = ConvTranspose2d(Cin, Cout, k=2, s=2)(high) + low.  NCHW in / NCHW out."""
    N, Cin, H, W = high.shape
    Nl, Cout, H2, W2 = low.shape
    assert Nl == N and H2 == 2 * H and W2 == 2 * W
    assert weight.shape == (Cin, Cout, 2, 2) and bias.shape == (Cout,)

    out_dtype = low.dtype
    if compute_dtype is None:
        compute_dtype = high.dtype  # bf16 inputs -> bf16 streaming automatically

    # Channel padding for lane friendliness.
    cin_p = max(8, _round_up(Cin, 8))
    cout_p = Cout if (4 * W * Cout) % 128 == 0 else _round_up(Cout, 32)

    x_bytes = jnp.dtype(compute_dtype).itemsize
    low_bytes = jnp.dtype(out_dtype).itemsize

    # Per-generation VMEM sizing (v5e/v6e: 128 MiB -> ~96 MiB limit, v7x: 64 -> 48).
    vmem_cap = _vmem_capacity_bytes()
    vmem_limit = max(32 << 20, min(int(0.75 * vmem_cap), vmem_cap - (8 << 20)))
    resident = 2 * cin_p * 4 * cout_p * x_bytes + 4 * cout_p * 4  # weight + bias copies
    budget = max(2 << 20, vmem_limit - resident - (8 << 20))

    th = _choose_th(H, W, N, cin_p, cout_p, x_bytes, low_bytes, budget)
    n_ht = H // th
    grid = N * n_ht

    # ---- layout glue ----
    # high: NCHW -> rows ordered (n, h_tile, w, h_in_tile), channels last, padded Cin.
    xh = jnp.transpose(high, (0, 2, 3, 1)).astype(compute_dtype)          # (N,H,W,Cin)
    xh = jnp.pad(xh, ((0, 0), (0, 0), (0, 0), (0, cin_p - Cin)))
    xh = xh.reshape(N, n_ht, th, W, cin_p).transpose(0, 1, 3, 2, 4)
    x_flat = xh.reshape(N * H * W, cin_p)

    # weight: (Cin, Cout, kH, kW) -> (cin_p, 4*cout_p) with columns (di, dj, c).
    w4 = jnp.transpose(weight, (0, 2, 3, 1)).astype(compute_dtype)        # (Cin,2,2,Cout)
    w4 = jnp.pad(w4, ((0, cin_p - Cin), (0, 0), (0, 0), (0, cout_p - Cout)))
    w2d = w4.reshape(cin_p, 4 * cout_p)

    # bias -> (1, 4*cout_p) in f32 (added before the final cast).
    b_p = jnp.pad(bias.astype(jnp.float32), (0, cout_p - Cout))
    b_tiled = jnp.tile(b_p, 4).reshape(1, 4 * cout_p)

    # low: NCHW -> NHWC; the (N*H, 4*W*cout_p) view below is a pure metadata
    # reshape of the contiguous NHWC buffer (row = (n, h), cols = (di, 2w+dj, c)).
    low_nhwc = jnp.transpose(low, (0, 2, 3, 1))
    low_nhwc = jnp.pad(low_nhwc, ((0, 0), (0, 0), (0, 0), (0, cout_p - Cout)))
    low_view = low_nhwc.reshape(N * H, 4 * W * cout_p)

    kernel = _make_kernel(th, W, cout_p)
    out_view = pl.pallas_call(
        kernel,
        out_shape=jax.ShapeDtypeStruct((N * H, 4 * W * cout_p), out_dtype),
        grid=(grid,),
        in_specs=[
            pl.BlockSpec((th * W, cin_p), lambda i: (i, 0)),
            pl.BlockSpec((cin_p, 4 * cout_p), lambda i: (0, 0)),  # resident weight
            pl.BlockSpec((1, 4 * cout_p), lambda i: (0, 0)),      # resident bias
            pl.BlockSpec((th, 4 * W * cout_p), lambda i: (i, 0)),
        ],
        out_specs=pl.BlockSpec((th, 4 * W * cout_p), lambda i: (i, 0)),
        compiler_params=pltpu.CompilerParams(
            dimension_semantics=("parallel",),
            vmem_limit_bytes=int(vmem_limit),
        ),
        # Output aliases the NHWC `low` buffer: no extra full-size HBM allocation.
        # NOTE: keyed to positional input index 3 -- keep the argument order
        # stable (no scalar-prefetch args may be inserted before it).
        input_output_aliases={3: 0},
    )(x_flat, w2d, b_tiled, low_view)

    # ---- back to NCHW ----
    out_nhwc = out_view.reshape(N, 2 * H, 2 * W, cout_p)
    if cout_p != Cout:
        out_nhwc = out_nhwc[..., :Cout]
    return jnp.transpose(out_nhwc, (0, 3, 1, 2))


def se_fpn_reference(high, low, weight, bias):
    # out[n, o, 2h+k, 2w+l] = sum_c high[n,c,h,w] * weight[c,o,k,l] + bias[o] + low[...]
    y = jnp.einsum(
        'nchw,cokl->nohkwl',
        high.astype(jnp.float32), weight.astype(jnp.float32),
        precision=jax.lax.Precision.HIGHEST)
    N, Co, H, _, W, _ = y.shape
    y = y.reshape(N, Co, 2 * H, 2 * W)
    return y + bias.astype(jnp.float32)[None, :, None, None] + low.astype(jnp.float32)


if __name__ == "__main__":
    # small but lane-friendly demo: 4*W*Cout = 1024 -> dense stores / DMA lines
    N, Cin, Cout, H, W = 2, 8, 32, 8, 8      # high: (2,8,8,8), low: (2,32,16,16)

    key = jax.random.PRNGKey(0)
    k_hi, k_lo, k_w, k_b = jax.random.split(key, 4)
    high = jax.random.normal(k_hi, (N, Cin, H, W), dtype=jnp.float32)
    low = jax.random.normal(k_lo, (N, Cout, 2 * H, 2 * W), dtype=jnp.float32)
    weight = jax.random.normal(k_w, (Cin, Cout, 2, 2), dtype=jnp.float32) * 0.1
    bias = jax.random.normal(k_b, (Cout,), dtype=jnp.float32) * 0.1

    fwd = jax.jit(se_fpn_forward)

    # f32 path (exact)
    out = jax.block_until_ready(fwd(high, low, weight, bias))
    ref = se_fpn_reference(high, low, weight, bias)
    assert out.shape == ref.shape == (N, Cout, 2 * H, 2 * W)
    assert jnp.allclose(out, ref, atol=1e-4, rtol=1e-4), "f32 mismatch vs reference"

    # bf16 streaming path (half the HBM bytes; f32 MXU accumulate + f32 adds)
    bf = jnp.bfloat16
    out_bf = jax.block_until_ready(
        fwd(high.astype(bf), low.astype(bf), weight.astype(bf), bias.astype(bf)))
    ref_bf = se_fpn_reference(high.astype(bf), low.astype(bf),
                              weight.astype(bf), bias.astype(bf))
    assert out_bf.dtype == bf
    assert jnp.allclose(out_bf.astype(jnp.float32), ref_bf, atol=5e-2, rtol=5e-2), \
        "bf16 mismatch vs reference"

    print("KERNEL_OK")
</pallas_src>

<mosaic_0001>
module attributes {stable_mosaic.version = 11 : i64} {
  func.func @kernel(%arg0: i32, %arg1: memref<64x8xf32, #tpu.memory_space<vmem>>, %arg2: memref<8x128xf32, #tpu.memory_space<vmem>>, %arg3: memref<1x128xf32, #tpu.memory_space<vmem>>, %arg4: memref<8x1024xf32, #tpu.memory_space<vmem>>, %arg5: memref<8x1024xf32, #tpu.memory_space<vmem>>) attributes {dimension_semantics = [#tpu.dimension_semantics<parallel>], iteration_bounds = array<i64: 2>, scalar_prefetch = 0 : i64, scratch_operands = 0 : i64, tpu.core_type = #tpu.core_type<tc>, window_params = [{transform_indices = @transform_0, window_bounds = array<i64: 64, 8>}, {pipeline_mode = #tpu.pipeline_mode<synchronous>, transform_indices = @transform_1, window_bounds = array<i64: 8, 128>}, {pipeline_mode = #tpu.pipeline_mode<synchronous>, transform_indices = @transform_2, window_bounds = array<i64: 1, 128>}, {transform_indices = @transform_3, window_bounds = array<i64: 8, 1024>}, {transform_indices = @transform_4, window_bounds = array<i64: 8, 1024>}]} {
    %c0 = arith.constant 0 : index
    %c0_0 = arith.constant 0 : index
    %0 = vector.load %arg1[%c0, %c0_0] : memref<64x8xf32, #tpu.memory_space<vmem>>, vector<64x8xf32>
    %c0_1 = arith.constant 0 : index
    %c0_2 = arith.constant 0 : index
    %1 = vector.load %arg2[%c0_1, %c0_2] : memref<8x128xf32, #tpu.memory_space<vmem>>, vector<8x128xf32>
    %cst = arith.constant dense<0.000000e+00> : vector<64x128xf32>
    %2 = tpu.matmul %0, %1, %cst {dimension_numbers = #tpu.dot_dimension_numbers<[1], [0], [0], [1], [0, 0, 1, 1], [], []>} : vector<64x8xf32>, vector<8x128xf32>, vector<64x128xf32> -> vector<64x128xf32>
    %c0_3 = arith.constant 0 : index
    %c0_4 = arith.constant 0 : index
    %3 = vector.load %arg3[%c0_3, %c0_4] : memref<1x128xf32, #tpu.memory_space<vmem>>, vector<1x128xf32>
    %4 = vector.broadcast %3 : vector<1x128xf32> to vector<64x128xf32>
    %5 = arith.addf %2, %4 : vector<64x128xf32>
    %c0_5 = arith.constant 0 : index
    %c0_6 = arith.constant 0 : index
    %6 = vector.load %arg4[%c0_5, %c0_6] : memref<8x1024xf32, #tpu.memory_space<vmem>>, vector<8x1024xf32>
    %7 = vector.extract_strided_slice %5 {offsets = [0, 0], sizes = [8, 64], strides = [1, 1]} : vector<64x128xf32> to vector<8x64xf32>
    %8 = vector.extract_strided_slice %6 {offsets = [0, 0], sizes = [8, 64], strides = [1, 1]} : vector<8x1024xf32> to vector<8x64xf32>
    %9 = arith.addf %7, %8 : vector<8x64xf32>
    %c0_7 = arith.constant 0 : index
    %c0_8 = arith.constant 0 : index
    %10 = vector.load %arg5[%c0_7, %c0_8] : memref<8x1024xf32, #tpu.memory_space<vmem>>, vector<8x64xf32>
    tpu.vector_store %arg5[%c0_7, %c0_8], %9 {strides = array<i32>} : memref<8x1024xf32, #tpu.memory_space<vmem>>, vector<8x64xf32>,
    %11 = vector.extract_strided_slice %5 {offsets = [8, 0], sizes = [8, 64], strides = [1, 1]} : vector<64x128xf32> to vector<8x64xf32>
    %12 = vector.extract_strided_slice %6 {offsets = [0, 64], sizes = [8, 64], strides = [1, 1]} : vector<8x1024xf32> to vector<8x64xf32>
    %13 = arith.addf %11, %12 : vector<8x64xf32>
    %c0_9 = arith.constant 0 : index
    %c64 = arith.constant 64 : index
    %14 = vector.load %arg5[%c0_9, %c64] : memref<8x1024xf32, #tpu.memory_space<vmem>>, vector<8x64xf32>
    tpu.vector_store %arg5[%c0_9, %c64], %13 {strides = array<i32>} : memref<8x1024xf32, #tpu.memory_space<vmem>>, vector<8x64xf32>,
    %15 = vector.extract_strided_slice %5 {offsets = [16, 0], sizes = [8, 64], strides = [1, 1]} : vector<64x128xf32> to vector<8x64xf32>
    %16 = vector.extract_strided_slice %6 {offsets = [0, 128], sizes = [8, 64], strides = [1, 1]} : vector<8x1024xf32> to vector<8x64xf32>
    %17 = arith.addf %15, %16 : vector<8x64xf32>
    %c0_10 = arith.constant 0 : index
    %c128 = arith.constant 128 : index
    %18 = vector.load %arg5[%c0_10, %c128] : memref<8x1024xf32, #tpu.memory_space<vmem>>, vector<8x64xf32>
    tpu.vector_store %arg5[%c0_10, %c128], %17 {strides = array<i32>} : memref<8x1024xf32, #tpu.memory_space<vmem>>, vector<8x64xf32>,
    %19 = vector.extract_strided_slice %5 {offsets = [24, 0], sizes = [8, 64], strides = [1, 1]} : vector<64x128xf32> to vector<8x64xf32>
    %20 = vector.extract_strided_slice %6 {offsets = [0, 192], sizes = [8, 64], strides = [1, 1]} : vector<8x1024xf32> to vector<8x64xf32>
    %21 = arith.addf %19, %20 : vector<8x64xf32>
    %c0_11 = arith.constant 0 : index
    %c192 = arith.constant 192 : index
    %22 = vector.load %arg5[%c0_11, %c192] : memref<8x1024xf32, #tpu.memory_space<vmem>>, vector<8x64xf32>
    tpu.vector_store %arg5[%c0_11, %c192], %21 {strides = array<i32>} : memref<8x1024xf32, #tpu.memory_space<vmem>>, vector<8x64xf32>,
    %23 = vector.extract_strided_slice %5 {offsets = [32, 0], sizes = [8, 64], strides = [1, 1]} : vector<64x128xf32> to vector<8x64xf32>
    %24 = vector.extract_strided_slice %6 {offsets = [0, 256], sizes = [8, 64], strides = [1, 1]} : vector<8x1024xf32> to vector<8x64xf32>
    %25 = arith.addf %23, %24 : vector<8x64xf32>
    %c0_12 = arith.constant 0 : index
    %c256 = arith.constant 256 : index
    %26 = vector.load %arg5[%c0_12, %c256] : memref<8x1024xf32, #tpu.memory_space<vmem>>, vector<8x64xf32>
    tpu.vector_store %arg5[%c0_12, %c256], %25 {strides = array<i32>} : memref<8x1024xf32, #tpu.memory_space<vmem>>, vector<8x64xf32>,
    %27 = vector.extract_strided_slice %5 {offsets = [40, 0], sizes = [8, 64], strides = [1, 1]} : vector<64x128xf32> to vector<8x64xf32>
    %28 = vector.extract_strided_slice %6 {offsets = [0, 320], sizes = [8, 64], strides = [1, 1]} : vector<8x1024xf32> to vector<8x64xf32>
    %29 = arith.addf %27, %28 : vector<8x64xf32>
    %c0_13 = arith.constant 0 : index
    %c320 = arith.constant 320 : index
    %30 = vector.load %arg5[%c0_13, %c320] : memref<8x1024xf32, #tpu.memory_space<vmem>>, vector<8x64xf32>
    tpu.vector_store %arg5[%c0_13, %c320], %29 {strides = array<i32>} : memref<8x1024xf32, #tpu.memory_space<vmem>>, vector<8x64xf32>,
    %31 = vector.extract_strided_slice %5 {offsets = [48, 0], sizes = [8, 64], strides = [1, 1]} : vector<64x128xf32> to vector<8x64xf32>
    %32 = vector.extract_strided_slice %6 {offsets = [0, 384], sizes = [8, 64], strides = [1, 1]} : vector<8x1024xf32> to vector<8x64xf32>
    %33 = arith.addf %31, %32 : vector<8x64xf32>
    %c0_14 = arith.constant 0 : index
    %c384 = arith.constant 384 : index
    %34 = vector.load %arg5[%c0_14, %c384] : memref<8x1024xf32, #tpu.memory_space<vmem>>, vector<8x64xf32>
    tpu.vector_store %arg5[%c0_14, %c384], %33 {strides = array<i32>} : memref<8x1024xf32, #tpu.memory_space<vmem>>, vector<8x64xf32>,
    %35 = vector.extract_strided_slice %5 {offsets = [56, 0], sizes = [8, 64], strides = [1, 1]} : vector<64x128xf32> to vector<8x64xf32>
    %36 = vector.extract_strided_slice %6 {offsets = [0, 448], sizes = [8, 64], strides = [1, 1]} : vector<8x1024xf32> to vector<8x64xf32>
    %37 = arith.addf %35, %36 : vector<8x64xf32>
    %c0_15 = arith.constant 0 : index
    %c448 = arith.constant 448 : index
    %38 = vector.load %arg5[%c0_15, %c448] : memref<8x1024xf32, #tpu.memory_space<vmem>>, vector<8x64xf32>
    tpu.vector_store %arg5[%c0_15, %c448], %37 {strides = array<i32>} : memref<8x1024xf32, #tpu.memory_space<vmem>>, vector<8x64xf32>,
    %39 = vector.extract_strided_slice %5 {offsets = [0, 64], sizes = [8, 64], strides = [1, 1]} : vector<64x128xf32> to vector<8x64xf32>
    %40 = vector.extract_strided_slice %6 {offsets = [0, 512], sizes = [8, 64], strides = [1, 1]} : vector<8x1024xf32> to vector<8x64xf32>
    %41 = arith.addf %39, %40 : vector<8x64xf32>
    %c0_16 = arith.constant 0 : index
    %c512 = arith.constant 512 : index
    %42 = vector.load %arg5[%c0_16, %c512] : memref<8x1024xf32, #tpu.memory_space<vmem>>, vector<8x64xf32>
    tpu.vector_store %arg5[%c0_16, %c512], %41 {strides = array<i32>} : memref<8x1024xf32, #tpu.memory_space<vmem>>, vector<8x64xf32>,
    %43 = vector.extract_strided_slice %5 {offsets = [8, 64], sizes = [8, 64], strides = [1, 1]} : vector<64x128xf32> to vector<8x64xf32>
    %44 = vector.extract_strided_slice %6 {offsets = [0, 576], sizes = [8, 64], strides = [1, 1]} : vector<8x1024xf32> to vector<8x64xf32>
    %45 = arith.addf %43, %44 : vector<8x64xf32>
    %c0_17 = arith.constant 0 : index
    %c576 = arith.constant 576 : index
    %46 = vector.load %arg5[%c0_17, %c576] : memref<8x1024xf32, #tpu.memory_space<vmem>>, vector<8x64xf32>
    tpu.vector_store %arg5[%c0_17, %c576], %45 {strides = array<i32>} : memref<8x1024xf32, #tpu.memory_space<vmem>>, vector<8x64xf32>,
    %47 = vector.extract_strided_slice %5 {offsets = [16, 64], sizes = [8, 64], strides = [1, 1]} : vector<64x128xf32> to vector<8x64xf32>
    %48 = vector.extract_strided_slice %6 {offsets = [0, 640], sizes = [8, 64], strides = [1, 1]} : vector<8x1024xf32> to vector<8x64xf32>
    %49 = arith.addf %47, %48 : vector<8x64xf32>
    %c0_18 = arith.constant 0 : index
    %c640 = arith.constant 640 : index
    %50 = vector.load %arg5[%c0_18, %c640] : memref<8x1024xf32, #tpu.memory_space<vmem>>, vector<8x64xf32>
    tpu.vector_store %arg5[%c0_18, %c640], %49 {strides = array<i32>} : memref<8x1024xf32, #tpu.memory_space<vmem>>, vector<8x64xf32>,
    %51 = vector.extract_strided_slice %5 {offsets = [24, 64], sizes = [8, 64], strides = [1, 1]} : vector<64x128xf32> to vector<8x64xf32>
    %52 = vector.extract_strided_slice %6 {offsets = [0, 704], sizes = [8, 64], strides = [1, 1]} : vector<8x1024xf32> to vector<8x64xf32>
    %53 = arith.addf %51, %52 : vector<8x64xf32>
    %c0_19 = arith.constant 0 : index
    %c704 = arith.constant 704 : index
    %54 = vector.load %arg5[%c0_19, %c704] : memref<8x1024xf32, #tpu.memory_space<vmem>>, vector<8x64xf32>
    tpu.vector_store %arg5[%c0_19, %c704], %53 {strides = array<i32>} : memref<8x1024xf32, #tpu.memory_space<vmem>>, vector<8x64xf32>,
    %55 = vector.extract_strided_slice %5 {offsets = [32, 64], sizes = [8, 64], strides = [1, 1]} : vector<64x128xf32> to vector<8x64xf32>
    %56 = vector.extract_strided_slice %6 {offsets = [0, 768], sizes = [8, 64], strides = [1, 1]} : vector<8x1024xf32> to vector<8x64xf32>
    %57 = arith.addf %55, %56 : vector<8x64xf32>
    %c0_20 = arith.constant 0 : index
    %c768 = arith.constant 768 : index
    %58 = vector.load %arg5[%c0_20, %c768] : memref<8x1024xf32, #tpu.memory_space<vmem>>, vector<8x64xf32>
    tpu.vector_store %arg5[%c0_20, %c768], %57 {strides = array<i32>} : memref<8x1024xf32, #tpu.memory_space<vmem>>, vector<8x64xf32>,
    %59 = vector.extract_strided_slice %5 {offsets = [40, 64], sizes = [8, 64], strides = [1, 1]} : vector<64x128xf32> to vector<8x64xf32>
    %60 = vector.extract_strided_slice %6 {offsets = [0, 832], sizes = [8, 64], strides = [1, 1]} : vector<8x1024xf32> to vector<8x64xf32>
    %61 = arith.addf %59, %60 : vector<8x64xf32>
    %c0_21 = arith.constant 0 : index
    %c832 = arith.constant 832 : index
    %62 = vector.load %arg5[%c0_21, %c832] : memref<8x1024xf32, #tpu.memory_space<vmem>>, vector<8x64xf32>
    tpu.vector_store %arg5[%c0_21, %c832], %61 {strides = array<i32>} : memref<8x1024xf32, #tpu.memory_space<vmem>>, vector<8x64xf32>,
    %63 = vector.extract_strided_slice %5 {offsets = [48, 64], sizes = [8, 64], strides = [1, 1]} : vector<64x128xf32> to vector<8x64xf32>
    %64 = vector.extract_strided_slice %6 {offsets = [0, 896], sizes = [8, 64], strides = [1, 1]} : vector<8x1024xf32> to vector<8x64xf32>
    %65 = arith.addf %63, %64 : vector<8x64xf32>
    %c0_22 = arith.constant 0 : index
    %c896 = arith.constant 896 : index
    %66 = vector.load %arg5[%c0_22, %c896] : memref<8x1024xf32, #tpu.memory_space<vmem>>, vector<8x64xf32>
    tpu.vector_store %arg5[%c0_22, %c896], %65 {strides = array<i32>} : memref<8x1024xf32, #tpu.memory_space<vmem>>, vector<8x64xf32>,
    %67 = vector.extract_strided_slice %5 {offsets = [56, 64], sizes = [8, 64], strides = [1, 1]} : vector<64x128xf32> to vector<8x64xf32>
    %68 = vector.extract_strided_slice %6 {offsets = [0, 960], sizes = [8, 64], strides = [1, 1]} : vector<8x1024xf32> to vector<8x64xf32>
    %69 = arith.addf %67, %68 : vector<8x64xf32>
    %c0_23 = arith.constant 0 : index
    %c960 = arith.constant 960 : index
    %70 = vector.load %arg5[%c0_23, %c960] : memref<8x1024xf32, #tpu.memory_space<vmem>>, vector<8x64xf32>
    tpu.vector_store %arg5[%c0_23, %c960], %69 {strides = array<i32>} : memref<8x1024xf32, #tpu.memory_space<vmem>>, vector<8x64xf32>,
    return
  }
  func.func @transform_0(%arg0: i32) -> (i32, i32) {
    %c0_i32 = arith.constant 0 : i32
    %c0_i32_0 = arith.constant 0 : i32
    return %arg0, %c0_i32 : i32, i32
  }
  func.func @transform_1(%arg0: i32) -> (i32, i32) {
    %c0_i32 = arith.constant 0 : i32
    %c0_i32_0 = arith.constant 0 : i32
    %c0_i32_1 = arith.constant 0 : i32
    return %c0_i32, %c0_i32_0 : i32, i32
  }
  func.func @transform_2(%arg0: i32) -> (i32, i32) {
    %c0_i32 = arith.constant 0 : i32
    %c0_i32_0 = arith.constant 0 : i32
    %c0_i32_1 = arith.constant 0 : i32
    return %c0_i32, %c0_i32_0 : i32, i32
  }
  func.func @transform_3(%arg0: i32) -> (i32, i32) {
    %c0_i32 = arith.constant 0 : i32
    %c0_i32_0 = arith.constant 0 : i32
    return %arg0, %c0_i32 : i32, i32
  }
  func.func @transform_4(%arg0: i32) -> (i32, i32) {
    %c0_i32 = arith.constant 0 : i32
    %c0_i32_0 = arith.constant 0 : i32
    return %arg0, %c0_i32 : i32, i32
  }
}

</mosaic_0001>

<bundles_post_ra>
// kernel: tile.9
= control target key start
LH: loop header
LB: loop body
LE: loop exit
PB: predicated region body
PF: predicated region fallthrough
CT: control target
= control target key end

     0   :  { %vm7_vm0 = vcmask 261120   ;;  %s37_s8 = smov 32   ;;  %s38_s9 = smov 64   ;;  %vm13_vm1 = vcmask 1048320   ;;  %vm19_vm2 = vcmask 785920   ;;  %vm25_vm3 = vcmask 523520   ;;  %s55_s0 = inlined_call_operand.vmem [shape: f32[4,32], index: 0, kind: input, shape index: {}]   ;;  %s56_s1 = inlined_call_operand.vmem [shape: f32[1,128], index: 1, kind: output, shape index: {}]  }
   0x1   :  { %v4_v0 = vld [vmem:[%s55_s0] sm:$0xf]  ;;  %s36_s0 = smov 96  }
   0x2   :  { %5 = vst [vmem:[#allocation1] sm:$0xf] %v4_v0 }
   0x9   :  { %v10_v1 = vld [vmem:[#allocation1 + $0x3] sm:$0x1]   ;;  %v22_v2 = vld [vmem:[#allocation1 + $0x1] sm:$0x1]   ;;  %v6_v3 = vld [vmem:[#allocation1] sm:$0x1]  }
   0xa   :  { %11 = vrot.lane.b32.xlu0 %v10_v1, %s36_s0  ;;  %23 = vrot.lane.b32.xlu1 %v22_v2, %s37_s8  ;;  %v16_v4 = vld [vmem:[#allocation1 + $0x2] sm:$0x1]   ;;  %8 = vst.msk [vmem:[#allocation0] sm:$0x1] %vm7_vm0, %v6_v3  }
   0xe   :  { %17 = vrot.lane.b32.xlu0 %v16_v4, %s38_s9 }
  0x7c   :  { %v12_v5 = vpop.permute.xlu0 %11   ;;  %v24_v6 = vpop.permute.xlu1 %23  }
  0x7d   :  { %14 = vst.msk [vmem:[#allocation0] sm:$0x1] %vm13_vm1, %v12_v5  }
  0x80   :  { %v18_v7 = vpop.permute.xlu0 %17  }
  0x81   :  { %20 = vst.msk [vmem:[#allocation0] sm:$0x1] %vm19_vm2, %v18_v7  }
  0x82   :  { %26 = vst.msk [vmem:[#allocation0] sm:$0x1] %vm25_vm3, %v24_v6  }
  0x89   :  { %v30_v8 = vld [vmem:[#allocation0] sm:$0x1] }
  0x8a   :  { %32 = vst [vmem:[%s56_s1] sm:$0x1] %v30_v8 }

// kernel: tile.8
= control target key start
LH: loop header
LB: loop body
LE: loop exit
PB: predicated region body
PF: predicated region fallthrough
CT: control target
= control target key end

     0   :  { %s22_s0 = inlined_call_operand.vmem [shape: f32[32], index: 0, kind: input, shape index: {}]   ;;  %s23_s1 = inlined_call_operand.vmem [shape: f32[4,32], index: 1, kind: output, shape index: {}]  }
   0x1   :  { %v4_v0 = vld [vmem:[%s22_s0] ss:$0 sm:$0xff] }
   0x2   :  { %5 = vst [vmem:[%s23_s1] sm:$0xf] %v4_v0 }

// kernel: se_fpn_forward.1
= control target key start
LH: loop header
LB: loop body
LE: loop exit
PB: predicated region body
PF: predicated region fallthrough
CT: control target
= control target key end

     0   :  { %s631_s15 = smov 0   ;;  %s748_s0 = inlined_call_operand.vmem [shape: f32[128,8], index: 0, kind: input, shape index: {}]   ;;  %s749_s1 = inlined_call_operand.vmem [shape: f32[8,128], index: 1, kind: input, shape index: {}]   ;;  %s750_s2 = inlined_call_operand.vmem [shape: f32[1,128], index: 2, kind: input, shape index: {}]   ;;  %s751_s3 = inlined_call_operand.vmem [shape: f32[16,1024], index: 3, kind: input, shape index: {}, may-alias: {3,4}]   ;;  %s752_s4 = inlined_call_operand.vmem [shape: f32[16,1024], index: 4, kind: output, shape index: {}, may-alias: {3,4}]  }
   0x1 LB: > { %s539_s16 = sadd.s32 4294967295, %s603_s15   ;;  %p543_p0 = scmp.ge.s32.totalorder %s603_s15, 1  ;;  %s603_s15 = sphi %s631_s15, %s14_s15  }
   0x2   : > { %p173_p1 = scmp.lt.s32.totalorder %s603_s15, 3 }
   0x4   : > { %p174_p2 = pnand %p543_p0, %p173_p1 }
   0x5   : > { %v228_v0 = vld [vmem:[%s749_s1] sm:$0xff] (!%p174_p2)  ;;  %s544_s19 = sshll.u32 (!%p174_p2), %s539_s16, 3  ;;  %p210_p3 = scmp.lt.s32.totalorder (!%p174_p2), %s539_s16, 1  ;;  %vm236_vm0 = vcmask (!%p174_p2), 64512   ;;  %vm375_vm1 = vcmask (!%p174_p2), 523264   ;;  %vm386_vm2 = vcmask (!%p174_p2), 1048064  }
   0x6   : > { %177 = sbr.rel (%p174_p2) target bundleno = 367 (0x16f), region = 36  ;;  %572 = vmatprep.subr.mxu0 (!%p174_p2), %v228_v0  ;;  %586 = vmatprep.subr.mxu1 (!%p174_p2), %v228_v0  ;;  %p205_p4 = scmp.lt.s32.totalorder (!%p174_p2), %s544_s19, 15  ;;  %v550_v21 = vld [vmem:[%s750_s2] ss:$0 sm:$0xff] (!%p174_p2) }
   0x7   : > { %573 = vmatpush3.msra.mxu0 (!%p174_p2), %v228_v0  ;;  %587 = vmatpush3.msra.mxu1 (!%p174_p2), %v228_v0  ;;  %s605_s28 = smov (!%p174_p2), 64  }
   0xd   : > { %s754_s16 = smov (!%p210_p3, %s539_s16), 1  ;;  %s756_s19 = smov (!%p205_p4, %s544_s19), 15 }
   0xe   : > { %s561_s20 = sshll.u32 %s754_s16, 6  ;;  %s545_s21 = sshll.u32 %s756_s19, 3 }
   0xf   : > { %s650_s24 = scalar_lea.vmem %s751_s3, %s561_s20  ;;  %s208_s27 = scalar_lea.vmem %s748_s0, %s545_s21 }
  0x10   : > { %v656_v1 = vld [vmem:[%s650_s24 + $0x20] sm:$0xff]  ;;  %v659_v2 = vld [vmem:[%s650_s24 + $0x30] sm:$0xff]  ;;  %v662_v3 = vld [vmem:[%s650_s24 + $0x28] sm:$0xff]  ;;  %s699_s7 = scalar_lea.vmem %s752_s4, %s561_s20 }
  0x11   : > { %v220_v4 = vld [vmem:[%s208_s27] sm:$0xff]  ;;  %v221_v6 = vld [vmem:[%s208_s27 + $0x8] sm:$0xff]  ;;  %425 = vrot.lane.b32.xlu0 %v656_v1, %s605_s28  ;;  %v222_v8 = vld [vmem:[%s208_s27 + $0x10] sm:$0xff] }
  0x12   : > { %v224_v5 = vld [vmem:[%s208_s27 + $0x20] sm:$0xff]  ;;  %574 = vmatprep.mubr.msk.f32.mxu0 %vm236_vm0, %v220_v4  ;;  %v225_v7 = vld [vmem:[%s208_s27 + $0x28] sm:$0xff]  ;;  %v226_v9 = vld [vmem:[%s208_s27 + $0x30] sm:$0xff]  ;;  %449 = vrot.lane.b32.xlu1 %v659_v2, %s605_s28 }
  0x13   : > { %580 = vmatprep.mubr.msk.f32.mxu1 %vm236_vm0, %v224_v5  ;;  %575 = vmatmul.mubr.msk.f32.vlgmr.msra.gmra.mrb[0].mxu0 %vm236_vm0, %v221_v6  ;;  %v223_v10 = vld [vmem:[%s208_s27 + $0x18] sm:$0xff]  ;;  %v366_v13 = vld [vmem:[%s650_s24] sm:$0xff]  ;;  %v367_v14 = vld [vmem:[%s650_s24 + $0x8] sm:$0xff] }
  0x14   : > { %581 = vmatmul.mubr.msk.f32.vlgmr.msra.gmra.mrb[0].mxu1 %vm236_vm0, %v225_v7  ;;  %577 = vmatprep.mubr.msk.f32.mxu0 %vm236_vm0, %v222_v8  ;;  %v227_v11 = vld [vmem:[%s208_s27 + $0x38] sm:$0xff]  ;;  %v368_v15 = vld [vmem:[%s650_s24 + $0x10] sm:$0xff] }
  0x15   : > { %583 = vmatprep.mubr.msk.f32.mxu1 %vm236_vm0, %v226_v9  ;;  %437 = vrot.lane.b32.xlu0 %v662_v3, %s605_s28  ;;  %v677_v12 = vld [vmem:[%s650_s24 + $0x38] sm:$0xff] }
  0x16   : > { %461 = vrot.lane.b32.xlu1 %v677_v12, %s605_s28  ;;  %v369_v16 = vld [vmem:[%s650_s24 + $0x18] sm:$0xff] }
  0x17   : > { %578 = vmatmul.mubr.msk.f32.gmra.mrb[2].mxu0 %vm236_vm0, %v223_v10 }
  0x18   : > { %584 = vmatmul.mubr.msk.f32.gmra.mrb[2].mxu1 %vm236_vm0, %v227_v11 }
  0x19   : > { %378 = vrot.lane.b32.xlu0 %v366_v13, %s605_s28 }
  0x1a   : > { %391 = vrot.lane.b32.xlu1 %v367_v14, %s605_s28 }
  0x1d   : > { %403 = vrot.lane.b32.xlu0 %v368_v15, %s605_s28 }
  0x1e   : > { %415 = vrot.lane.b32.xlu1 %v369_v16, %s605_s28 }
  0x83   : > { %v426_v17 = vpop.permute.xlu0 %425 }
  0x84   : > { %v450_v18 = vpop.permute.xlu1 %449 }
  0x87   : > { %v438_v19 = vpop.permute.xlu0 %437 }
  0x88   : > { %v462_v20 = vpop.permute.xlu1 %461 }
  0x8b   : > { %v379_v22 = vpop.permute.xlu0 %378 }
  0x8c   : > { %v392_v31 = vpop.permute.xlu1 %391 }
  0x8f   : > { %v404_v48 = vpop.permute.xlu0 %403 }
  0x90   : > { %v416_v52 = vpop.permute.xlu1 %415 }
  0xe6   : > { %v576_v23 = vpop.f32.mrb[0].mxu0 }
  0xe7   : > { %v582_v24 = vpop.f32.mrb[0].mxu1  ;;  %v333_v25 = vadd.f32 %v576_v23, %v550_v21  ;;  %v327_v26 = vpop.f32.mrb[1].mxu0 }
  0xe8   : > { %v347_v27 = vpop.f32.mrb[1].mxu1  ;;  %v328_v28 = vadd.f32 %v550_v21, %v327_v26  ;;  %v353_v45 = vadd.f32 %v582_v24, %v550_v21 }
  0xe9   : > { %v348_v29 = vadd.f32 %v550_v21, %v347_v27  ;;  %v381_v30 = vadd.f32 %v379_v22, %v333_v25  ;;  %v434_v55 = vadd.f32 %v656_v1, %v333_v25 }
  0xea   : > { %v374_v32 = vadd.f32 %v366_v13, %v328_v28  ;;  %v579_v34 = vpop.f32.mrb[2].mxu0  ;;  %v428_v41 = vadd.f32 %v426_v17, %v328_v28  ;;  %v406_v51 = vadd.f32 %v404_v48, %v353_v45  ;;  %v458_v58 = vadd.f32 %v659_v2, %v353_v45 }
  0xeb   : > { %v400_v33 = vadd.f32 %v368_v15, %v348_v29  ;;  %v585_v35 = vpop.f32.mrb[2].mxu1  ;;  %v343_v36 = vadd.f32 %v579_v34, %v550_v21  ;;  %383 = vrot.lane.b32.xlu0 %v381_v30, %s605_s28  ;;  %v337_v38 = vpop.f32.mrb[3].mxu0  ;;  %v452_v46 = vadd.f32 %v450_v18, %v348_v29 }
  0xec   : > { %v357_v37 = vpop.f32.mrb[3].mxu1  ;;  %v338_v40 = vadd.f32 %v550_v21, %v337_v38  ;;  %376 = vst.msk [vmem:[%s699_s7] sm:$0xff] %vm375_vm1, %v374_v32  ;;  %v363_v49 = vadd.f32 %v585_v35, %v550_v21 }
  0xed   : > { %v358_v39 = vadd.f32 %v550_v21, %v357_v37  ;;  %401 = vst.msk [vmem:[%s699_s7 + $0x10] sm:$0xff] %vm375_vm1, %v400_v33  ;;  %v394_v42 = vadd.f32 %v392_v31, %v343_v36  ;;  %v446_v59 = vadd.f32 %v662_v3, %v343_v36 }
  0xee   : > { %v388_v44 = vadd.f32 %v367_v14, %v338_v40  ;;  %v440_v47 = vadd.f32 %v438_v19, %v338_v40  ;;  %v418_v53 = vadd.f32 %v416_v52, %v363_v49  ;;  %v470_v62 = vadd.f32 %v677_v12, %v363_v49 }
  0xef   : > { %v412_v43 = vadd.f32 %v369_v16, %v358_v39  ;;  %396 = vrot.lane.b32.xlu1 %v394_v42, %s605_s28  ;;  %430 = vrot.lane.b32.xlu0 %v428_v41, %s605_s28  ;;  %v464_v50 = vadd.f32 %v462_v20, %v358_v39 }
  0xf0   : > { %389 = vst.msk [vmem:[%s699_s7 + $0x8] sm:$0xff] %vm375_vm1, %v388_v44 }
  0xf1   : > { %413 = vst.msk [vmem:[%s699_s7 + $0x18] sm:$0xff] %vm375_vm1, %v412_v43 }
  0xf3   : > { %442 = vrot.lane.b32.xlu1 %v440_v47, %s605_s28  ;;  %454 = vrot.lane.b32.xlu0 %v452_v46, %s605_s28 }
  0xf7   : > { %466 = vrot.lane.b32.xlu1 %v464_v50, %s605_s28  ;;  %408 = vrot.lane.b32.xlu0 %v406_v51, %s605_s28 }
  0xfb   : > { %420 = vrot.lane.b32.xlu1 %v418_v53, %s605_s28 }
 0x15d   : > { %v384_v54 = vpop.permute.xlu0 %383 }
 0x15e   : > { %387 = vst.msk [vmem:[%s699_s7] sm:$0xff] %vm386_vm2, %v384_v54 }
 0x161   : > { %v397_v56 = vpop.permute.xlu1 %396  ;;  %v431_v57 = vpop.permute.xlu0 %430 }
 0x162   : > { %399 = vst.msk [vmem:[%s699_s7 + $0x8] sm:$0xff] %vm386_vm2, %v397_v56 }
 0x163   : > { %433 = vst.msk [vmem:[%s699_s7 + $0x20] sm:$0xff] %vm375_vm1, %v431_v57 }
 0x164   : > { %435 = vst.msk [vmem:[%s699_s7 + $0x20] sm:$0xff] %vm386_vm2, %v434_v55 }
 0x165   : > { %v443_v60 = vpop.permute.xlu1 %442  ;;  %v455_v61 = vpop.permute.xlu0 %454 }
 0x166   : > { %445 = vst.msk [vmem:[%s699_s7 + $0x28] sm:$0xff] %vm375_vm1, %v443_v60  ;;  %457 = vst.msk [vmem:[%s699_s7 + $0x30] sm:$0xff] %vm375_vm1, %v455_v61 }
 0x167   : > { %447 = vst.msk [vmem:[%s699_s7 + $0x28] sm:$0xff] %vm386_vm2, %v446_v59  ;;  %459 = vst.msk [vmem:[%s699_s7 + $0x30] sm:$0xff] %vm386_vm2, %v458_v58 }
 0x169   : > { %v467_v63 = vpop.permute.xlu1 %466  ;;  %v409_v0 = vpop.permute.xlu0 %408 }
 0x16a   : > { %469 = vst.msk [vmem:[%s699_s7 + $0x38] sm:$0xff] %vm375_vm1, %v467_v63 }
 0x16b   : > { %411 = vst.msk [vmem:[%s699_s7 + $0x10] sm:$0xff] %vm386_vm2, %v409_v0  ;;  %471 = vst.msk [vmem:[%s699_s7 + $0x38] sm:$0xff] %vm386_vm2, %v470_v62 }
 0x16d   : > { %v421_v1 = vpop.permute.xlu1 %420 }
 0x16e   : > { %423 = vst.msk [vmem:[%s699_s7 + $0x18] sm:$0xff] %vm386_vm2, %v421_v1 }
 0x16f PF: > { %s14_s15 = sadd.s32 1, %s603_s15  }
 0x170   : > { %p11_p5 = scmp.ge.s32.totalorder %s14_s15, 4  }
 0x172   :  { %13 = sbr.rel (!%p11_p5) target bundleno = 1 (0x1), region = 69 }

</bundles_post_ra>
